<compile_context>
chip_gen: v5e
topology: v5e:2x2
jax: 0.10.0
libtpu: 0.0.40
codegen_flags: <defaults>
</compile_context>

<pallas_src>
import functools

import jax
import jax.numpy as jnp
from jax.experimental import pallas as pl
from jax.experimental.pallas import tpu as pltpu


def _basic_conv1d_kernel(
    x_ref, w_ref, g_ref, b_ref, o_ref,
    sum_ref, sq_ref, scale_ref, bias_ref,
    *, active, eps, inv_nl,
):
    # x_ref:  (C_in, T)  tile of x (N dim squeezed)
    # w_ref:  (C_out, C_in)          g_ref/b_ref: (C_out, 1)
    # o_ref:  (C_out, T) tile of the output (N dim squeezed)
    # scratch: sum/sq/scale/bias are (C_out, 1) f32, persistent across the grid
    phase = pl.program_id(0)
    n = pl.program_id(1)
    l = pl.program_id(2)
    first_tile = jnp.logical_and(n == 0, l == 0)

    # k=1 Conv1d (no bias) == per-point channel matmul on the MXU.
    y = jnp.dot(
        w_ref[...].astype(jnp.float32),
        x_ref[...].astype(jnp.float32),
        preferred_element_type=jnp.float32,
    )  # (C_out, T)

    # ---- phase 0: accumulate BatchNorm batch statistics over all tiles -----
    @pl.when(phase == 0)
    def _():
        @pl.when(first_tile)
        def _():
            sum_ref[...] = jnp.zeros_like(sum_ref)
            sq_ref[...] = jnp.zeros_like(sq_ref)

        sum_ref[...] += jnp.sum(y, axis=1, keepdims=True)
        sq_ref[...] += jnp.sum(y * y, axis=1, keepdims=True)

    # ---- phase 1: finalize stats once, then normalize + Mish + write -------
    @pl.when(phase == 1)
    def _():
        @pl.when(first_tile)
        def _():
            # Biased variance (PyTorch BatchNorm training-mode normalization).
            # NOTE: E[y^2]-mean^2 is accumulated in f32; fine for BN-scale
            # activations.  (A two-pass variance would need a third phase.)
            mean = sum_ref[...] * inv_nl
            var = jnp.maximum(sq_ref[...] * inv_nl - mean * mean, 0.0)
            scale = jax.lax.rsqrt(var + eps) * g_ref[...].astype(jnp.float32)
            scale_ref[...] = scale
            bias_ref[...] = b_ref[...].astype(jnp.float32) - mean * scale

        out = y * scale_ref[...] + bias_ref[...]

        if active:
            # Mish(v) = v * tanh(softplus(v)); softplus threshold=20 (PyTorch).
            # tanh(log1p(t)) == (u - 1)/(u + 1) with u = (1 + t)^2: saves one
            # EUP transcendental per element vs exp+log1p+tanh.
            # (approx=True would shave another EUP op at ~1e-3 accuracy cost.)
            t = jnp.exp(jnp.minimum(out, 20.0))
            u = (1.0 + t) * (1.0 + t)
            tanh_sp = (u - 1.0) * pl.reciprocal(u + 1.0, approx=False)
            out = jnp.where(out > 20.0, out, out * tanh_sp)

        o_ref[...] = out.astype(o_ref.dtype)


def _pick_block_l(L):
    """Largest lane-dense tile (multiple of 128, <= 2048) that divides L."""
    if L % 128 != 0:
        return L                      # full-extent block is always legal
    for t in (2048, 1024, 512, 256, 128):
        if L % t == 0:
            return t
    return L


def basic_conv1d(x, weight, gamma, beta, *, active=True, eps=1e-5, block_l=None):
    """x: (N, C_in, L) f32; weight: (C_out, C_in[, 1]); gamma/beta: (C_out,)."""
    if weight.ndim == 3:              # PyTorch Conv1d weight (C_out, C_in, 1)
        weight = weight[..., 0]
    N, C_in, L = x.shape
    C_out = weight.shape[0]

    if block_l is None:
        block_l = _pick_block_l(L)
    assert L % block_l == 0, "block_l must divide L"
    assert block_l == L or block_l % 128 == 0, "block_l must be lane-aligned"
    num_l = L // block_l

    w = weight.astype(jnp.float32)
    g2 = gamma.reshape(C_out, 1).astype(jnp.float32)
    b2 = beta.reshape(C_out, 1).astype(jnp.float32)

    kernel = functools.partial(
        _basic_conv1d_kernel,
        active=active,
        eps=float(eps),
        inv_nl=float(1.0 / (N * L)),
    )

    # VMEM budget: double-buffered x & out tiles + resident weight/BN scratch.
    vmem_bytes = 4 * (2 * C_in * block_l + 2 * C_out * block_l
                      + C_out * C_in + 8 * C_out)
    vmem_limit = int(min(max(2 * vmem_bytes, 32 * 1024 * 1024),
                         56 * 1024 * 1024))   # stay under v7x's 64 MiB VMEM

    flops = 2 * 2 * N * L * C_out * C_in + 10 * N * L * C_out
    transcendentals = (2 * N * L * C_out) if active else 0
    bytes_accessed = 4 * (2 * N * C_in * L + N * C_out * L
                          + C_out * C_in + 2 * C_out)

    out = pl.pallas_call(
        kernel,
        grid=(2, N, num_l),           # (phase, batch, L-tiles)
        in_specs=[
            # x in native NCL layout; N squeezed -> kernel sees (C_in, block_l).
            pl.BlockSpec((None, C_in, block_l), lambda p, n, l: (n, 0, l)),
            pl.BlockSpec((C_out, C_in), lambda p, n, l: (0, 0)),
            pl.BlockSpec((C_out, 1), lambda p, n, l: (0, 0)),
            pl.BlockSpec((C_out, 1), lambda p, n, l: (0, 0)),
        ],
        # During phase 0 every step maps to block (0,0,0) so no stale VMEM is
        # ever written back; phase 1 walks and writes every output block once.
        out_specs=pl.BlockSpec((None, C_out, block_l),
                               lambda p, n, l: (n * p, 0, l * p)),
        out_shape=jax.ShapeDtypeStruct((N, C_out, L), jnp.float32),
        scratch_shapes=[
            pltpu.VMEM((C_out, 1), jnp.float32),   # sum
            pltpu.VMEM((C_out, 1), jnp.float32),   # sum of squares
            pltpu.VMEM((C_out, 1), jnp.float32),   # BN-folded scale
            pltpu.VMEM((C_out, 1), jnp.float32),   # BN-folded bias
        ],
        compiler_params=pltpu.CompilerParams(
            # All axes are part of / ordered around the stats reduction, so
            # none may be megacore-sharded.
            dimension_semantics=("arbitrary", "arbitrary", "arbitrary"),
            vmem_limit_bytes=vmem_limit,
        ),
        cost_estimate=pl.CostEstimate(
            flops=flops,
            transcendentals=transcendentals,
            bytes_accessed=bytes_accessed,
        ),
    )(x, w, g2, b2)
    return out


def _reference(x, weight, gamma, beta, *, active=True, eps=1e-5):
    # Pure-JAX reference with the same (training-mode BN) semantics.
    y = jnp.einsum("oc,ncl->nol", weight, x)
    mean = jnp.mean(y, axis=(0, 2), keepdims=True)
    var = jnp.mean((y - mean) ** 2, axis=(0, 2), keepdims=True)
    y = (y - mean) / jnp.sqrt(var + eps)
    y = y * gamma[None, :, None] + beta[None, :, None]
    if active:
        sp = jnp.where(y > 20.0, y, jnp.log1p(jnp.exp(jnp.minimum(y, 20.0))))
        y = y * jnp.tanh(sp)
    return y


if __name__ == "__main__":
    key = jax.random.PRNGKey(0)
    k1, k2, k3, k4 = jax.random.split(key, 4)

    # --- small shape consistent with the module's Conv1d NCL input ----------
    N, C_in, C_out, L = 2, 4, 8, 16
    x = jax.random.normal(k1, (N, C_in, L), dtype=jnp.float32)
    weight = 0.1 * jax.random.normal(k2, (C_out, C_in), dtype=jnp.float32)
    gamma = jnp.ones((C_out,), dtype=jnp.float32)    # BatchNorm1d default init
    beta = jnp.zeros((C_out,), dtype=jnp.float32)

    out = jax.block_until_ready(basic_conv1d(x, weight, gamma, beta, active=True))
    ref = _reference(x, weight, gamma, beta, active=True)
    assert out.shape == (N, C_out, L)
    assert jnp.allclose(out, ref, atol=2e-4, rtol=2e-4)

    # also check the no-activation path
    out_na = jax.block_until_ready(basic_conv1d(x, weight, gamma, beta, active=False))
    ref_na = _reference(x, weight, gamma, beta, active=False)
    assert jnp.allclose(out_na, ref_na, atol=2e-4, rtol=2e-4)

    # --- multi-tile shape: exercises the two-phase tiled stats reduction ----
    N2, C_in2, C_out2, L2 = 2, 8, 16, 512
    x2 = jax.random.normal(k3, (N2, C_in2, L2), dtype=jnp.float32)
    w2 = 0.1 * jax.random.normal(k4, (C_out2, C_in2), dtype=jnp.float32)
    g2 = 1.0 + 0.1 * jax.random.normal(k1, (C_out2,), dtype=jnp.float32)
    b2 = 0.1 * jax.random.normal(k2, (C_out2,), dtype=jnp.float32)

    out2 = jax.block_until_ready(
        basic_conv1d(x2, w2, g2, b2, active=True, block_l=128))
    ref2 = _reference(x2, w2, g2, b2, active=True)
    assert out2.shape == (N2, C_out2, L2)
    assert jnp.allclose(out2, ref2, atol=2e-4, rtol=2e-4)

    print("KERNEL_OK")
</pallas_src>

<mosaic_0001>
module attributes {stable_mosaic.version = 11 : i64} {
  func.func @_basic_conv1d_kernel(%arg0: i32, %arg1: i32, %arg2: i32, %arg3: memref<1x4x16xf32, #tpu.memory_space<vmem>>, %arg4: memref<8x4xf32, #tpu.memory_space<vmem>>, %arg5: memref<8x1xf32, #tpu.memory_space<vmem>>, %arg6: memref<8x1xf32, #tpu.memory_space<vmem>>, %arg7: memref<1x8x16xf32, #tpu.memory_space<vmem>>, %arg8: memref<8x1xf32, #tpu.memory_space<vmem>>, %arg9: memref<8x1xf32, #tpu.memory_space<vmem>>, %arg10: memref<8x1xf32, #tpu.memory_space<vmem>>, %arg11: memref<8x1xf32, #tpu.memory_space<vmem>>) attributes {dimension_semantics = [#tpu.dimension_semantics<arbitrary>, #tpu.dimension_semantics<arbitrary>, #tpu.dimension_semantics<arbitrary>], iteration_bounds = array<i64: 2, 2, 1>, scalar_prefetch = 0 : i64, scratch_operands = 4 : i64, tpu.core_type = #tpu.core_type<tc>, window_params = [{transform_indices = @transform_0, window_bounds = array<i64: 1, 4, 16>}, {pipeline_mode = #tpu.pipeline_mode<synchronous>, transform_indices = @transform_1, window_bounds = array<i64: 8, 4>}, {pipeline_mode = #tpu.pipeline_mode<synchronous>, transform_indices = @transform_2, window_bounds = array<i64: 8, 1>}, {pipeline_mode = #tpu.pipeline_mode<synchronous>, transform_indices = @transform_3, window_bounds = array<i64: 8, 1>}, {transform_indices = @transform_4, window_bounds = array<i64: 1, 8, 16>}]} {
    %c0_i32 = arith.constant 0 : i32
    %0 = arith.cmpi eq, %arg1, %c0_i32 : i32
    %c0_i32_0 = arith.constant 0 : i32
    %1 = arith.cmpi eq, %arg2, %c0_i32_0 : i32
    %2 = arith.andi %0, %1 : i1
    %c0 = arith.constant 0 : index
    %c0_1 = arith.constant 0 : index
    %3 = vector.load %arg4[%c0, %c0_1] : memref<8x4xf32, #tpu.memory_space<vmem>>, vector<8x4xf32>
    %c0_2 = arith.constant 0 : index
    %c0_3 = arith.constant 0 : index
    %c0_4 = arith.constant 0 : index
    %4 = vector.load %arg3[%c0_2, %c0_3, %c0_4] : memref<1x4x16xf32, #tpu.memory_space<vmem>>, vector<1x4x16xf32>
    %5 = vector.shape_cast %4 : vector<1x4x16xf32> to vector<4x16xf32>
    %cst = arith.constant dense<0.000000e+00> : vector<8x16xf32>
    %6 = tpu.matmul %3, %5, %cst {dimension_numbers = #tpu.dot_dimension_numbers<[1], [0], [0], [1], [0, 0, 1, 1], [], []>} : vector<8x4xf32>, vector<4x16xf32>, vector<8x16xf32> -> vector<8x16xf32>
    %c0_i32_5 = arith.constant 0 : i32
    %7 = arith.cmpi eq, %arg0, %c0_i32_5 : i32
    %8 = arith.extui %7 : i1 to i32
    %c0_i32_6 = arith.constant 0 : i32
    %9 = arith.cmpi ne, %8, %c0_i32_6 : i32
    scf.if %9 {
      %13 = arith.extui %2 : i1 to i32
      %c0_i32_8 = arith.constant 0 : i32
      %14 = arith.cmpi ne, %13, %c0_i32_8 : i32
      scf.if %14 {
        %cst_19 = arith.constant 0.000000e+00 : f32
        %26 = vector.broadcast %cst_19 : f32 to vector<8x1xf32>
        %c0_20 = arith.constant 0 : index
        %c0_21 = arith.constant 0 : index
        %27 = vector.load %arg8[%c0_20, %c0_21] : memref<8x1xf32, #tpu.memory_space<vmem>>, vector<8x1xf32>
        tpu.vector_store %arg8[%c0_20, %c0_21], %26 {strides = array<i32>} : memref<8x1xf32, #tpu.memory_space<vmem>>, vector<8x1xf32>,
        %cst_22 = arith.constant 0.000000e+00 : f32
        %28 = vector.broadcast %cst_22 : f32 to vector<8x1xf32>
        %c0_23 = arith.constant 0 : index
        %c0_24 = arith.constant 0 : index
        %29 = vector.load %arg9[%c0_23, %c0_24] : memref<8x1xf32, #tpu.memory_space<vmem>>, vector<8x1xf32>
        tpu.vector_store %arg9[%c0_23, %c0_24], %28 {strides = array<i32>} : memref<8x1xf32, #tpu.memory_space<vmem>>, vector<8x1xf32>,
      } else {
      }
      %c0_9 = arith.constant 0 : index
      %c0_10 = arith.constant 0 : index
      %15 = vector.load %arg8[%c0_9, %c0_10] : memref<8x1xf32, #tpu.memory_space<vmem>>, vector<8x1xf32>
      %cst_11 = arith.constant dense<0.000000e+00> : vector<8xf32>
      %16 = vector.multi_reduction <add>, %6, %cst_11 [1] : vector<8x16xf32> to vector<8xf32>
      %17 = vector.shape_cast %16 : vector<8xf32> to vector<8x1xf32>
      %18 = arith.addf %15, %17 : vector<8x1xf32>
      %c0_12 = arith.constant 0 : index
      %c0_13 = arith.constant 0 : index
      %19 = vector.load %arg8[%c0_12, %c0_13] : memref<8x1xf32, #tpu.memory_space<vmem>>, vector<8x1xf32>
      tpu.vector_store %arg8[%c0_12, %c0_13], %18 {strides = array<i32>} : memref<8x1xf32, #tpu.memory_space<vmem>>, vector<8x1xf32>,
      %c0_14 = arith.constant 0 : index
      %c0_15 = arith.constant 0 : index
      %20 = vector.load %arg9[%c0_14, %c0_15] : memref<8x1xf32, #tpu.memory_space<vmem>>, vector<8x1xf32>
      %21 = arith.mulf %6, %6 : vector<8x16xf32>
      %cst_16 = arith.constant dense<0.000000e+00> : vector<8xf32>
      %22 = vector.multi_reduction <add>, %21, %cst_16 [1] : vector<8x16xf32> to vector<8xf32>
      %23 = vector.shape_cast %22 : vector<8xf32> to vector<8x1xf32>
      %24 = arith.addf %20, %23 : vector<8x1xf32>
      %c0_17 = arith.constant 0 : index
      %c0_18 = arith.constant 0 : index
      %25 = vector.load %arg9[%c0_17, %c0_18] : memref<8x1xf32, #tpu.memory_space<vmem>>, vector<8x1xf32>
      tpu.vector_store %arg9[%c0_17, %c0_18], %24 {strides = array<i32>} : memref<8x1xf32, #tpu.memory_space<vmem>>, vector<8x1xf32>,
    } else {
    }
    %c1_i32 = arith.constant 1 : i32
    %10 = arith.cmpi eq, %arg0, %c1_i32 : i32
    %11 = arith.extui %10 : i1 to i32
    %c0_i32_7 = arith.constant 0 : i32
    %12 = arith.cmpi ne, %11, %c0_i32_7 : i32
    scf.if %12 {
      %13 = arith.extui %2 : i1 to i32
      %c0_i32_8 = arith.constant 0 : i32
      %14 = arith.cmpi ne, %13, %c0_i32_8 : i32
      scf.if %14 {
        %c0_22 = arith.constant 0 : index
        %c0_23 = arith.constant 0 : index
        %42 = vector.load %arg8[%c0_22, %c0_23] : memref<8x1xf32, #tpu.memory_space<vmem>>, vector<8x1xf32>
        %cst_24 = arith.constant 3.125000e-02 : f32
        %43 = vector.broadcast %cst_24 : f32 to vector<8x1xf32>
        %44 = arith.mulf %42, %43 : vector<8x1xf32>
        %c0_25 = arith.constant 0 : index
        %c0_26 = arith.constant 0 : index
        %45 = vector.load %arg9[%c0_25, %c0_26] : memref<8x1xf32, #tpu.memory_space<vmem>>, vector<8x1xf32>
        %cst_27 = arith.constant 3.125000e-02 : f32
        %46 = vector.broadcast %cst_27 : f32 to vector<8x1xf32>
        %47 = arith.mulf %45, %46 : vector<8x1xf32>
        %48 = arith.mulf %44, %44 : vector<8x1xf32>
        %49 = arith.subf %47, %48 : vector<8x1xf32>
        %cst_28 = arith.constant 0.000000e+00 : f32
        %50 = vector.broadcast %cst_28 : f32 to vector<8x1xf32>
        %51 = arith.maximumf %49, %50 : vector<8x1xf32>
        %cst_29 = arith.constant 9.99999974E-6 : f32
        %52 = vector.broadcast %cst_29 : f32 to vector<8x1xf32>
        %53 = arith.addf %51, %52 : vector<8x1xf32>
        %54 = math.rsqrt %53 : vector<8x1xf32>
        %c0_30 = arith.constant 0 : index
        %c0_31 = arith.constant 0 : index
        %55 = vector.load %arg5[%c0_30, %c0_31] : memref<8x1xf32, #tpu.memory_space<vmem>>, vector<8x1xf32>
        %56 = arith.mulf %54, %55 : vector<8x1xf32>
        %c0_32 = arith.constant 0 : index
        %c0_33 = arith.constant 0 : index
        %57 = vector.load %arg10[%c0_32, %c0_33] : memref<8x1xf32, #tpu.memory_space<vmem>>, vector<8x1xf32>
        tpu.vector_store %arg10[%c0_32, %c0_33], %56 {strides = array<i32>} : memref<8x1xf32, #tpu.memory_space<vmem>>, vector<8x1xf32>,
        %c0_34 = arith.constant 0 : index
        %c0_35 = arith.constant 0 : index
        %58 = vector.load %arg6[%c0_34, %c0_35] : memref<8x1xf32, #tpu.memory_space<vmem>>, vector<8x1xf32>
        %59 = arith.mulf %44, %56 : vector<8x1xf32>
        %60 = arith.subf %58, %59 : vector<8x1xf32>
        %c0_36 = arith.constant 0 : index
        %c0_37 = arith.constant 0 : index
        %61 = vector.load %arg11[%c0_36, %c0_37] : memref<8x1xf32, #tpu.memory_space<vmem>>, vector<8x1xf32>
        tpu.vector_store %arg11[%c0_36, %c0_37], %60 {strides = array<i32>} : memref<8x1xf32, #tpu.memory_space<vmem>>, vector<8x1xf32>,
      } else {
      }
      %c0_9 = arith.constant 0 : index
      %c0_10 = arith.constant 0 : index
      %15 = vector.load %arg10[%c0_9, %c0_10] : memref<8x1xf32, #tpu.memory_space<vmem>>, vector<8x1xf32>
      %16 = vector.broadcast %15 : vector<8x1xf32> to vector<8x16xf32>
      %17 = arith.mulf %6, %16 : vector<8x16xf32>
      %c0_11 = arith.constant 0 : index
      %c0_12 = arith.constant 0 : index
      %18 = vector.load %arg11[%c0_11, %c0_12] : memref<8x1xf32, #tpu.memory_space<vmem>>, vector<8x1xf32>
      %19 = vector.broadcast %18 : vector<8x1xf32> to vector<8x16xf32>
      %20 = arith.addf %17, %19 : vector<8x16xf32>
      %cst_13 = arith.constant 2.000000e+01 : f32
      %21 = vector.broadcast %cst_13 : f32 to vector<8x16xf32>
      %22 = arith.minimumf %20, %21 : vector<8x16xf32>
      %23 = math.exp %22 : vector<8x16xf32>
      %cst_14 = arith.constant 1.000000e+00 : f32
      %24 = vector.broadcast %cst_14 : f32 to vector<8x16xf32>
      %25 = arith.addf %24, %23 : vector<8x16xf32>
      %cst_15 = arith.constant 1.000000e+00 : f32
      %26 = vector.broadcast %cst_15 : f32 to vector<8x16xf32>
      %27 = arith.addf %26, %23 : vector<8x16xf32>
      %28 = arith.mulf %25, %27 : vector<8x16xf32>
      %cst_16 = arith.constant 1.000000e+00 : f32
      %29 = vector.broadcast %cst_16 : f32 to vector<8x16xf32>
      %30 = arith.subf %28, %29 : vector<8x16xf32>
      %cst_17 = arith.constant 1.000000e+00 : f32
      %31 = vector.broadcast %cst_17 : f32 to vector<8x16xf32>
      %32 = arith.addf %28, %31 : vector<8x16xf32>
      %33 = tpu.reciprocal %32 : vector<8x16xf32> -> vector<8x16xf32>
      %34 = arith.mulf %30, %33 : vector<8x16xf32>
      %cst_18 = arith.constant 2.000000e+01 : f32
      %35 = vector.broadcast %cst_18 : f32 to vector<8x16xf32>
      %36 = arith.cmpf ogt, %20, %35 : vector<8x16xf32>
      %37 = arith.mulf %20, %34 : vector<8x16xf32>
      %38 = arith.select %36, %20, %37 : vector<8x16xi1>, vector<8x16xf32>
      %c0_19 = arith.constant 0 : index
      %c0_20 = arith.constant 0 : index
      %c0_21 = arith.constant 0 : index
      %39 = vector.load %arg7[%c0_19, %c0_20, %c0_21] : memref<1x8x16xf32, #tpu.memory_space<vmem>>, vector<1x8x16xf32>
      %40 = vector.shape_cast %39 : vector<1x8x16xf32> to vector<8x16xf32>
      %41 = vector.shape_cast %38 : vector<8x16xf32> to vector<1x8x16xf32>
      tpu.vector_store %arg7[%c0_19, %c0_20, %c0_21], %41 {strides = array<i32>} : memref<1x8x16xf32, #tpu.memory_space<vmem>>, vector<1x8x16xf32>,
    } else {
    }
    return
  }
  func.func @transform_0(%arg0: i32, %arg1: i32, %arg2: i32) -> (i32, i32, i32) {
    %c0_i32 = arith.constant 0 : i32
    %c0_i32_0 = arith.constant 0 : i32
    return %arg1, %c0_i32, %arg2 : i32, i32, i32
  }
  func.func @transform_1(%arg0: i32, %arg1: i32, %arg2: i32) -> (i32, i32) {
    %c0_i32 = arith.constant 0 : i32
    %c0_i32_0 = arith.constant 0 : i32
    %c0_i32_1 = arith.constant 0 : i32
    return %c0_i32, %c0_i32_0 : i32, i32
  }
  func.func @transform_2(%arg0: i32, %arg1: i32, %arg2: i32) -> (i32, i32) {
    %c0_i32 = arith.constant 0 : i32
    %c0_i32_0 = arith.constant 0 : i32
    %c0_i32_1 = arith.constant 0 : i32
    return %c0_i32, %c0_i32_0 : i32, i32
  }
  func.func @transform_3(%arg0: i32, %arg1: i32, %arg2: i32) -> (i32, i32) {
    %c0_i32 = arith.constant 0 : i32
    %c0_i32_0 = arith.constant 0 : i32
    %c0_i32_1 = arith.constant 0 : i32
    return %c0_i32, %c0_i32_0 : i32, i32
  }
  func.func @transform_4(%arg0: i32, %arg1: i32, %arg2: i32) -> (i32, i32, i32) {
    %0 = arith.muli %arg1, %arg0 : i32
    %1 = arith.muli %arg2, %arg0 : i32
    %c0_i32 = arith.constant 0 : i32
    %c0_i32_0 = arith.constant 0 : i32
    return %0, %c0_i32, %1 : i32, i32, i32
  }
}

</mosaic_0001>

<bundles_post_ra>
// kernel: tpu_custom_call.1
= control target key start
LH: loop header
LB: loop body
LE: loop exit
PB: predicated region body
PF: predicated region fallthrough
CT: control target
= control target key end

     0   :  { %9 = vsyncpa [#allocation7], 0  ;;  %s832_s0 = inlined_call_operand.vmem [shape: f32[2,4,16], index: 0, kind: input, shape index: {}]   ;;  %s833_s1 = inlined_call_operand.vmem [shape: f32[8,4], index: 1, kind: input, shape index: {}]   ;;  %s834_s2 = inlined_call_operand.vmem [shape: f32[8,1], index: 2, kind: input, shape index: {}]   ;;  %s835_s3 = inlined_call_operand.vmem [shape: f32[8,1], index: 3, kind: input, shape index: {}]   ;;  %s836_s4 = inlined_call_operand.hbm [shape: f32[2,8,16], index: 4, kind: output, shape index: {}]  }
   0x1   :  { %11 = vsyncpa [#allocation7 + $0x1], 0  ;;  %s679_s15 = smov 0   ;;  %s681_s16 = smov 0  }
   0x2   :  { %s683_s17 = smov 0   ;;  %s685_s18 = smov 0  }
   0x3   :  { %s687_s19 = smov 0   ;;  %s689_s20 = smov 0  }
   0x4   :  { %s691_s21 = smov 0   ;;  %s693_s22 = smov 0  }
   0x5 LB: > { %s458_s23 = sadd.s32 4294967295, %s650_s22   ;;  %s459_s24 = sadd.s32 4294967294, %s650_s22   ;;  %s650_s22 = sphi %s693_s22, %s17_s22   ;;  %s646_s21 = sphi %s691_s21, %s845_s21   ;;  %s642_s20 = sphi %s689_s20, %s844_s20   ;;  %s638_s19 = sphi %s687_s19, %s843_s19   ;;  %s634_s18 = sphi %s685_s18, %s842_s18   ;;  %s630_s17 = sphi %s683_s17, %s841_s17   ;;  %s626_s16 = sphi %s681_s16, %s840_s16   ;;  %s622_s15 = sphi %s679_s15, %s839_s15  }
   0x6   : > { %s32_s25 = sadd.s32 1, %s642_s20  ;;  %s36_s26 = sadd.s32 1, %s646_s21 }
   0x7   : > { %p34_p0 = scmp.ge.s32.totalorder %s32_s25, 2  ;;  %s131_s27 = smul.u32 %s642_s20, %s646_s21 }
   0x8   : > { %p150_p1 = scmp.ne.s32.totalorder %s630_s17, %s626_s16  ;;  %p151_p2 = scmp.eq.s32.totalorder %s458_s23, 3 }
   0x9   : > { %s847_s25 = smov (%p34_p0, %s32_s25), 0  ;;  %s849_s26 = smov (!%p34_p0, %s36_s26), %s646_s21 }
   0xa   : > { %p156_p3 = scmp.ne.s32.totalorder %s626_s16, %s622_s15  ;;  %p38_p4 = scmp.ge.s32.totalorder %s849_s26, 2 }
   0xb   : > { %p157_p5 = scmp.eq.s32.totalorder %s459_s24, 3  ;;  %p732_p6 = por %p151_p2, %p150_p1 }
   0xc   : > { %p462_p7 = scmp.ge.s32.totalorder %s650_s22, 1  ;;  %s851_s26 = smov (%p38_p4, %s849_s26), 0 }
   0xd   : > { %p739_p8 = por %p157_p5, %p156_p3  ;;  %p194_p9 = scmp.lt.s32.totalorder %s650_s22, 5 }
   0xe   : > { %s133_s30 = smul.u32 %s851_s26, %s847_s25  ;;  %s140_s6 = sadd.s32 1, %s630_s17 }
   0xf   : > { %p195_p10 = pnand %p462_p7, %p194_p9 }
  0x10   : > { %s135_s5 = ssub.s32 %s131_s27, %s133_s30  ;;  %s219_s8 = sand.u32 (!%p195_p10), 1, %s626_s16  }
  0x11   : > { %p138_p11 = scmp.eq.s32.totalorder %s135_s5, 0  ;;  %198 = sbr.rel (%p195_p10) target bundleno = 516 (0x204), region = 36 }
  0x12   : > { %p222_p12 = scmp.lt.s32.totalorder (!%p195_p10), %s634_s18, 1  ;;  %s754_s9 = sshll.u32 (!%p195_p10), %s219_s8, 3 }
  0x13   : > { %s748_s7 = scalar_select %p138_p11, %s630_s17, %s140_s6  }
  0x14   : > { %p231_p13 = scmp.eq.s32.totalorder (!%p195_p10), %s634_s18, 0  ;;  %s221_s27 = scalar_lea.vmem (!%p195_p10), [#allocation6], %s754_s9 }
  0x15   : > { %p468_p0 = scmp.ne.s32.totalorder (!%p195_p10), %s638_s19, 0 }
  0x16   : > { %s223_s10 = scalar_select %p222_p12, %s634_s18, 1  ;;  %vm241_vm0 = vcmask 1043456   ;;  %v235_v0 = vld [vmem:[%s833_s1] sm:$0xff]  ;;  %vm237_vm1 = vcmask 31744  }
  0x18   : > { %s464_s11 = sshll.u32 %s223_s10, 2 }
  0x19   : > { %s228_s14 = scalar_lea.vmem %s832_s0, %s464_s11 }
  0x1a   : > { %v236_v1 = vld [vmem:[%s228_s14] sm:$0xf] }
  0x1b   : > { %466 = vmatpush.msk.msra.mxu0 %vm241_vm0, %v236_v1 }
  0x1c   : > { %467 = vmatmul.msk.f32.vlgmr.msra.gmra.mxu0 %vm237_vm1, %v235_v0 }
  0x95   : > { %268 = sbr.rel (%p468_p0) target bundleno = 288 (0x120), region = 40 }
  0x99   : > { %v764_v2 = vpop.f32.mrf.mxu0 }
  0x9a   : > { %270 = sbr.rel (!%p231_p13) target bundleno = 159 (0x9f), region = 44  ;;  %vm271_vm2 = vcmask (%p231_p13), 7168   ;;  %v652_v3 = vmov (%p231_p13), 0.0  }
  0x9b   : > { %272 = vst.msk [vmem:[#allocation2] sm:$0xff] (%p231_p13), %vm271_vm2, %v652_v3 }
  0x9c   : > { %273 = vst.msk [vmem:[#allocation3] sm:$0xff] (%p231_p13), %vm271_vm2, %v652_v3 }
  0x9f PF: > { %vm275_vm3 = vcmask 130048   ;;  %v283_v5 = vmul.f32 %v764_v2, %v764_v2  ;;  %vm280_vm4 = vcmask 7168  }
  0xa0   : > { %v276_v4 = vsel %vm275_vm3, %v764_v2, 0.0 }
  0xa1   : > { %277 = vadd.xlane.f32.xlu0 %v276_v4  ;;  %v284_v6 = vsel %vm275_vm3, %v283_v5, 0.0 }
  0xa2   : > { %v274_v7 = vld [vmem:[#allocation2] sm:$0xff] }
  0xa3   : > { %v282_v10 = vld [vmem:[#allocation3] sm:$0xff] }
  0xa9   : > { %285 = vadd.xlane.f32.xlu0 %v284_v6 }
 0x114   : > { %v278_v8 = vpop.xlane.xlu0 %277 }
 0x115   : > { %v279_v9 = vadd.f32 %v278_v8, %v274_v7 }
 0x117   : > { %281 = vst.msk [vmem:[#allocation2] sm:$0xff] %vm280_vm4, %v279_v9 }
 0x11c   : > { %v286_v11 = vpop.xlane.xlu0 %285 }
 0x11d   : > { %v287_v12 = vadd.f32 %v286_v11, %v282_v10 }
 0x11f   : > { %288 = vst.msk [vmem:[#allocation3] sm:$0xff] %vm280_vm4, %v287_v12 }
 0x120 PF: > { %p469_p1 = scmp.ne.s32.totalorder %s638_s19, 1 }
 0x122   : > { %292 = sbr.rel (%p469_p1) target bundleno = 499 (0x1f3), region = 48 }
 0x127   : > { %294 = sbr.rel (!%p231_p13) target bundleno = 331 (0x14b), region = 52  ;;  %v295_v13 = vld [vmem:[#allocation2] sm:$0xff] (%p231_p13)  ;;  %v297_v14 = vld [vmem:[#allocation3] sm:$0xff] (%p231_p13)  ;;  %vm315_vm8 = vcmask (%p231_p13), 7168  }
 0x128   : > { %v296_v15 = vmul.f32 (%p231_p13), 0.03125, %v295_v13  ;;  %v298_v16 = vmul.f32 (%p231_p13), 0.03125, %v297_v14  ;;  %v313_v27 = vld [vmem:[%s834_s2] sm:$0xff] (%p231_p13) }
 0x129   : > { %v317_v30 = vld [vmem:[%s835_s3] sm:$0xff] (%p231_p13) }
 0x12a   : > { %v299_v17 = vmul.f32 (%p231_p13), %v296_v15, %v296_v15 }
 0x12c   : > { %v300_v18 = vsub.f32 %v298_v16, %v299_v17 }
 0x12e   : > { %v301_v19 = vmax.f32 %v300_v18, 0.0 }
 0x130   : > { %v302_v20 = vadd.f32 1e-05, %v301_v19 }
 0x132   : > { %549 = vrsqrt.f32 %v302_v20  ;;  %vm309_vm5 = vweird.f32 %v302_v20 }
 0x138   : > { %v550_v21 = vpop.eup %549 }
 0x139   : > { %v304_v22 = vmul.f32 %v550_v21, %v302_v20  ;;  %vm310_vm6 = vweird.f32 %v550_v21 }
 0x13a   : > { %vm311_vm7 = vmor %vm309_vm5, %vm310_vm6 }
 0x13b   : > { %v305_v23 = vmul.f32 %v550_v21, %v304_v22 }
 0x13d   : > { %v306_v24 = vmul.f32 0.5, %v305_v23 }
 0x13f   : > { %v307_v25 = vsub.f32 1.5, %v306_v24 }
 0x141   : > { %v308_v26 = vmul.f32 %v550_v21, %v307_v25 }
 0x143   : > { %v312_v28 = vsel %vm311_vm7, %v550_v21, %v308_v26 }
 0x144   : > { %v314_v29 = vmul.f32 %v313_v27, %v312_v28 }
 0x146   : > { %316 = vst.msk [vmem:[#allocation4] sm:$0xff] %vm315_vm8, %v314_v29  ;;  %v318_v31 = vmul.f32 %v314_v29, %v296_v15 }
 0x148   : > { %v319_v32 = vsub.f32 %v317_v30, %v318_v31 }
 0x14a   : > { %320 = vst.msk [vmem:[#allocation5] sm:$0xff] %vm315_vm8, %v319_v32 }
 0x14b PF: > { %v653_v34 = vmov 0   ;;  %vm360_vm13 = vcmask 130048  }
 0x14c   : > { %551 = vset.pattern.permute.xlu0 %v653_v34 }
 0x14d   : > { %v321_v33 = vld [vmem:[#allocation4] sm:$0xff] }
 0x14e   : > { %324 = vperm.xlu0 %551, %v321_v33  }
 0x151   : > { %v328_v35 = vld [vmem:[#allocation5] sm:$0xff] }
 0x156   : > { %331 = vperm.xlu0 %551, %v328_v35  }
 0x1c0   : > { %v325_v36 = vpop.permute.xlu0 %324 }
 0x1c1   : > { %v327_v37 = vmul.f32 %v325_v36, %v764_v2 }
 0x1c8   : > { %v332_v38 = vpop.permute.xlu0 %331 }
 0x1c9   : > { %v334_v39 = vadd.f32 %v332_v38, %v327_v37 }
 0x1cb   : > { %v335_v40 = vmin.f32 %v334_v39, 20.0  ;;  %vm357_vm14 = vcmp.gt.f32.partialorder %v334_v39, 20.0 }
 0x1cd   : > { %v336_v41 = vmul.f32 1.442695, %v335_v40 }
 0x1cf   : > { %552 = vpow2.f32 %v336_v41 }
 0x1d5   : > { %v553_v42 = vpop.eup %552 }
 0x1d6   : > { %v338_v43 = vadd.f32 1.0, %v553_v42 }
 0x1d8   : > { %v339_v44 = vmul.f32 %v338_v43, %v338_v43 }
 0x1da   : > { %v341_v45 = vadd.f32 1.0, %v339_v44  ;;  %v470_v54 = vadd.f32 -1.0, %v339_v44 }
 0x1dc   : > { %554 = vrcp.f32 %v341_v45  ;;  %v353_v49 = vand.u32 2147483648, %v341_v45  ;;  %v351_v51 = vand.u32 2147483647, %v341_v45  ;;  %vm347_vm10 = vweird.f32 %v341_v45 }
 0x1de   : > { %v354_v53 = vor.u32 1.1754944e-38, %v353_v49  ;;  %vm352_vm12 = vcmp.eq.f32.partialorder %v351_v51, 8.507059e+37 }
 0x1e2   : > { %v555_v46 = vpop.eup %554 }
 0x1e3   : > { %v343_v47 = vmul.f32 %v555_v46, %v341_v45  ;;  %vm348_vm9 = vweird.f32 %v555_v46 }
 0x1e4   : > { %vm349_vm11 = vmor %vm347_vm10, %vm348_vm9 }
 0x1e5   : > { %v344_v48 = vsub.f32 1.0, %v343_v47 }
 0x1e7   : > { %v345_v50 = vmul.f32 %v555_v46, %v344_v48 }
 0x1e9   : > { %v346_v52 = vadd.f32 %v555_v46, %v345_v50 }
 0x1eb   : > { %v350_v55 = vsel %vm349_vm11, %v555_v46, %v346_v52 }
 0x1ec   : > { %v355_v56 = vsel %vm352_vm12, %v354_v53, %v350_v55 }
 0x1ed   : > { %v356_v57 = vmul.f32 %v470_v54, %v355_v56 }
 0x1ef   : > { %v358_v58 = vmul.f32 %v356_v57, %v334_v39 }
 0x1f1   : > { %v359_v59 = vsel %vm357_vm14, %v334_v39, %v358_v58 }
 0x1f2   : > { %361 = vst.msk [vmem:[%s221_s27] sm:$0xff] %vm360_vm13, %v359_v59 }
 0x1f3 PF: > { %s370_s11 = smul.u32 %s634_s18, %s638_s19  ;;  %s378_s12 = sshll.u32 %s221_s27, 4  ;;  %s379_s12 = int_to_ptr.vmem [resolvable:$true] %s378_s12 }
 0x1f4   : > { %s363_s5 = scalar_lea.sflag [#allocation7], %s219_s8  ;;  %s576_s9 = scalar_lea.hbm %s836_s4, 16 }
 0x1f5   : > { %s472_s13 = sshll.u32 %s370_s11, 3 }
 0x1f6   : > { %s376_s24 = scalar_lea.hbm %s836_s4, %s472_s13 }
 0x1f7   : > { %s380_s30 = sshll.u32 %s376_s24, 4  ;;  %s381_s30 = int_to_ptr.hbm [resolvable:$true] %s380_s30 }
 0x1f8   : > { %s570_s6 = sshra.s32 %s381_s30, 4  ;;  %s571_s6 = int_to_ptr.hbm [resolvable:$true] %s570_s6 }
 0x1f9   : > { %s572_s10 = scalar_lea.hbm %s571_s6, 8  ;;  %p577_p5 = scmp.lt.s32.totalorder %s571_s6, %s836_s4 }
 0x1fa   : > { %p573_p2 = scmp.ne.s32.totalorder %s571_s6, %s572_s10  ;;  %p578_p7 = scmp.lt.s32.totalorder %s576_s9, %s572_s10 }
 0x1fc   : > { %p574_p3 = pnand %p573_p2, %p732_p6  ;;  %p579_p9 = por %p578_p7, %p577_p5 }
 0x1fe   : > { %p575_p4 = pneg %p574_p3 }
 0x200   : > { %p580_p10 = pnand %p579_p9, %p575_p4 }
 0x202   : > { %583 = shalt.err (!%p580_p10)
}
 0x203   : > { %476 = dma.vmem_to_hbm [thread:$0]  (%p732_p6), %s379_s12, 128, %s381_s30, %s363_s5  }
 0x204 PF: > { %p482_p11 = scmp.ge.s32.totalorder %s650_s22, 2  ;;  %s392_s8 = sand.u32 1, %s622_s15  }
 0x205   : > { %s393_s13 = scalar_lea.sflag [#allocation7], %s392_s8 }
 0x206   : > { %p479_p12 = pnand %p482_p11, %p739_p8 }
 0x208   : > { %p480_p13 = pneg %p479_p12 }
 0x20a   : > { %617 = dma.done.wait (%p480_p13), %s393_s13, 128  }
 0x20b   : > { %619 = vsyncadd (%p480_p13), %s393_s13, 4294967168  ;;  %s17_s22 = sadd.s32 1, %s650_s22   ;;  %s839_s15 = smov %s626_s16 }
 0x20c   : > { %p14_p0 = scmp.ge.s32.totalorder %s17_s22, 6   ;;  %s840_s16 = smov %s630_s17 }
 0x20d   : > { %s841_s17 = smov %s748_s7  ;;  %s842_s18 = smov %s642_s20 }
 0x20e   : > { %s843_s19 = smov %s646_s21  ;;  %s844_s20 = smov %s847_s25 }
 0x20f   : > { %s845_s21 = smov %s851_s26  ;;  %16 = sbr.rel (!%p14_p0) target bundleno = 5 (0x5), region = 87 }
 0x214   :  { %399 = vsyncpa [#allocation7], 1 }
 0x215   :  { %401 = vsyncpa [#allocation7 + $0x1], 1 }

</bundles_post_ra>
